<compile_context>
chip_gen: v7x
topology: tpu7x:2x2x1
jax: 0.10.0
libtpu: 0.0.40
codegen_flags: <defaults>
</compile_context>

<pallas_src>
import functools

import jax
import jax.numpy as jnp
from jax.experimental import pallas as pl
from jax.experimental.pallas import tpu as pltpu


def _physical_vmem_bytes():
    """Per-core physical VMEM (128 MiB v5e/v6e, 64 MiB v7x)."""
    try:
        return int(pltpu.get_tpu_info().vmem_capacity_bytes)
    except Exception:
        return 64 << 20          # conservative (v7x-sized) fallback


# ---------------------------------------------------------------------------
# Shared resident-path math: pooled MLP + sigmoid + channel-weighted sum.
# ---------------------------------------------------------------------------
def _ca_resident_compute(x_f32, w1, w2, hw):
    # Fused avg/max pooling -> one (C, 2) operand so both MLP branches share a
    # single matmul each (ReLU / linear layers act column-wise, so this is
    # exactly mlp(avg) + mlp(max)).
    avg_p = jnp.sum(x_f32, axis=1, keepdims=True) * (1.0 / hw)   # (C, 1)
    max_p = jnp.max(x_f32, axis=1, keepdims=True)                # (C, 1)
    pooled = jnp.concatenate([avg_p, max_p], axis=1)             # (C, 2)

    h = jnp.maximum(jnp.dot(w1, pooled, preferred_element_type=jnp.float32), 0.0)
    out2 = jnp.dot(w2, h, preferred_element_type=jnp.float32)    # (C, 2)
    scale = jax.nn.sigmoid(out2[:, 0:1] + out2[:, 1:2])          # (C, 1)

    # Channel-weighted sum on the MXU: (C,1)^T @ (C,HW) -> (1, HW).
    return jax.lax.dot_general(
        scale, x_f32,
        dimension_numbers=(((0,), (0,)), ((), ())),
        preferred_element_type=jnp.float32)                      # (1, HW)


# Resident, double-buffered (BlockSpec-pipelined) variant.
def _ca_resident_kernel(x_ref, w1_ref, w2_ref, o_ref, *, hw):
    x = x_ref[...].astype(jnp.float32)                           # (C, HW)
    o = _ca_resident_compute(x, w1_ref[...], w2_ref[...], hw)
    o_ref[...] = o.astype(o_ref.dtype)


# Resident, single-buffered variant: x stays in HBM (pl.ANY); one VMEM buffer,
# manual blocking DMA per batch element.  Used when 2x the slab does not fit
# but 1x does -> still a single HBM read of x.
def _ca_resident_sb_kernel(x_hbm, w1_ref, w2_ref, o_ref, x_vmem, *, hw):
    b = pl.program_id(0)
    pltpu.sync_copy(x_hbm.at[b], x_vmem)                         # HBM -> VMEM
    x = x_vmem[...].astype(jnp.float32)                          # (C, HW)
    o = _ca_resident_compute(x, w1_ref[...], w2_ref[...], hw)
    o_ref[...] = o.astype(o_ref.dtype)


# ---------------------------------------------------------------------------
# Tiled pass 1: accumulate per-channel sum and max over HW tiles in VMEM
# scratch; write the (C,2) output block once, at the last tile.
# ---------------------------------------------------------------------------
def _ca_pool_kernel(x_ref, o_ref, sum_sc, max_sc, *, hw, tile_hw):
    t = pl.program_id(1)
    nt = pl.num_programs(1)
    x = x_ref[...].astype(jnp.float32)                           # (C, TILE)

    @pl.when(t == 0)
    def _init():
        sum_sc[...] = jnp.zeros_like(sum_sc)
        max_sc[...] = jnp.full_like(max_sc, -jnp.inf)

    def _accum(xs, xm):
        sum_sc[...] = sum_sc[...] + jnp.sum(xs, axis=1, keepdims=True)
        max_sc[...] = jnp.maximum(max_sc[...], jnp.max(xm, axis=1, keepdims=True))

    if hw % tile_hw != 0:
        # Only the final (partial) tile pays for the overhang masking:
        # 0 for the sum, -inf for the max.
        @pl.when(t == nt - 1)
        def _last_tile():
            lane = jax.lax.broadcasted_iota(jnp.int32, x.shape, 1)
            valid = (t * tile_hw + lane) < hw
            _accum(jnp.where(valid, x, 0.0), jnp.where(valid, x, -jnp.inf))

        @pl.when(t != nt - 1)
        def _full_tile():
            _accum(x, x)
    else:
        _accum(x, x)

    @pl.when(t == nt - 1)
    def _write_out():
        o_ref[...] = jnp.concatenate([sum_sc[...], max_sc[...]], axis=1)  # (C, 2)


# ---------------------------------------------------------------------------
# Tiled pass 2: weighted channel sum per HW tile via a (1,C)x(C,TILE) matmul.
# ---------------------------------------------------------------------------
def _ca_wsum_kernel(scale_ref, x_ref, o_ref):
    s = scale_ref[...]                                           # (1, C) f32
    x = x_ref[...].astype(jnp.float32)                           # (C, TILE)
    o_ref[...] = jnp.dot(
        s, x, preferred_element_type=jnp.float32).astype(o_ref.dtype)


# ---------------------------------------------------------------------------
# Wrapper
# ---------------------------------------------------------------------------
def channel_attention(x, w1, w2, *, stream_dtype=None, force_tiled=False,
                      force_single_buffer=False, tile_hw=None):
    """x: (B, C, H, W); w1: (C//r, C); w2: (C, C//r). Returns (B, 1, H, W)."""
    B, C, H, W = x.shape
    HW = H * W
    hidden = w1.shape[0]
    out_dtype = x.dtype

    x_flat = x.reshape(B, C, HW)
    if stream_dtype is not None and x_flat.dtype != jnp.dtype(stream_dtype):
        # Optional narrower streaming dtype (e.g. bf16) — halves HBM bytes on
        # every path; all accumulation stays f32 inside the kernels.
        x_flat = x_flat.astype(stream_dtype)
    w1f = w1.astype(jnp.float32)
    w2f = w2.astype(jnp.float32)

    itemsize = x_flat.dtype.itemsize

    # ------- generation-aware VMEM budgeting ------------------------------
    vmem_cap = _physical_vmem_bytes()
    big_vmem = vmem_cap >= (96 << 20)          # v5e/v6e: 128 MiB; v7x: 64 MiB
    vmem_budget = vmem_cap - ((16 << 20) if big_vmem else (8 << 20))

    x_bytes = C * HW * itemsize
    f32_work = C * HW * 4 if itemsize < 4 else 0      # in-kernel f32 upcast copy
    out_bytes = HW * jnp.dtype(out_dtype).itemsize
    w_bytes = (w1.size + w2.size) * 4
    slack = 2 << 20

    need_db = 2 * x_bytes + f32_work + 2 * out_bytes + 2 * w_bytes + slack
    need_sb = x_bytes + f32_work + 2 * out_bytes + 2 * w_bytes + slack

    use_db = (not force_tiled and not force_single_buffer
              and need_db <= vmem_budget)
    use_sb = (not force_tiled and not use_db and need_sb <= vmem_budget
              and (force_single_buffer or need_db > vmem_budget))

    # ------- resident double-buffered path (1x HBM read, prefetch overlap) --
    if use_db:
        vmem_limit = int(min(max(need_db + (8 << 20), 32 << 20), vmem_budget))
        out_flat = pl.pallas_call(
            functools.partial(_ca_resident_kernel, hw=HW),
            out_shape=jax.ShapeDtypeStruct((B, 1, HW), out_dtype),
            grid_spec=pltpu.PrefetchScalarGridSpec(
                num_scalar_prefetch=0,
                grid=(B,),
                in_specs=[
                    pl.BlockSpec((pl.Squeezed(), C, HW), lambda b: (b, 0, 0)),
                    pl.BlockSpec((hidden, C), lambda b: (0, 0)),
                    pl.BlockSpec((C, hidden), lambda b: (0, 0)),
                ],
                out_specs=pl.BlockSpec((pl.Squeezed(), 1, HW),
                                       lambda b: (b, 0, 0)),
            ),
            compiler_params=pltpu.CompilerParams(
                dimension_semantics=("parallel",),
                vmem_limit_bytes=vmem_limit,
            ),
        )(x_flat, w1f, w2f)
        return out_flat.reshape(B, 1, H, W)

    # ------- resident single-buffered path (1x HBM read, no overlap) --------
    if use_sb:
        vmem_limit = int(min(max(need_sb + (8 << 20), 32 << 20), vmem_budget))
        out_flat = pl.pallas_call(
            functools.partial(_ca_resident_sb_kernel, hw=HW),
            out_shape=jax.ShapeDtypeStruct((B, 1, HW), out_dtype),
            grid_spec=pltpu.PrefetchScalarGridSpec(
                num_scalar_prefetch=0,
                grid=(B,),
                in_specs=[
                    pl.BlockSpec(memory_space=pl.ANY),      # x stays in HBM
                    pl.BlockSpec((hidden, C), lambda b: (0, 0)),
                    pl.BlockSpec((C, hidden), lambda b: (0, 0)),
                ],
                out_specs=pl.BlockSpec((pl.Squeezed(), 1, HW),
                                       lambda b: (b, 0, 0)),
                scratch_shapes=[pltpu.VMEM((C, HW), x_flat.dtype)],
            ),
            compiler_params=pltpu.CompilerParams(
                dimension_semantics=("parallel",),
                vmem_limit_bytes=vmem_limit,
            ),
        )(x_flat, w1f, w2f)
        return out_flat.reshape(B, 1, H, W)

    # ------- tiled two-pass fallback (very large HW) -------------------------
    if tile_hw is None:
        budget = (16 << 20) if big_vmem else (8 << 20)   # per x block
        tile_cap = 32768 if big_vmem else 8192
        tile_hw = max(128, min((budget // (C * itemsize)) // 128 * 128, tile_cap))
    if tile_hw >= HW:
        tile_hw = HW                                     # single full-extent tile
    else:
        tile_hw = max(128, (tile_hw // 128) * 128)       # lane-dense multiple of 128
    n_t = -(-HW // tile_hw)

    # x tile double-buffered + f32 upcast / mask temporaries + pass-2 out tile.
    tiled_need = (2 * C * tile_hw * itemsize + 3 * C * tile_hw * 4
                  + 2 * tile_hw * 4 + slack)
    tiled_vmem = int(min(max(tiled_need + (8 << 20), 32 << 20), vmem_budget))

    # Pass 1: per-channel sum / max over spatial tiles (scratch accumulators).
    pooled = pl.pallas_call(
        functools.partial(_ca_pool_kernel, hw=HW, tile_hw=tile_hw),
        out_shape=jax.ShapeDtypeStruct((B, C, 2), jnp.float32),
        grid_spec=pltpu.PrefetchScalarGridSpec(
            num_scalar_prefetch=0,
            grid=(B, n_t),
            in_specs=[pl.BlockSpec((pl.Squeezed(), C, tile_hw),
                                   lambda b, t: (b, 0, t))],
            out_specs=pl.BlockSpec((pl.Squeezed(), C, 2),
                                   lambda b, t: (b, 0, 0)),
            scratch_shapes=[pltpu.VMEM((C, 1), jnp.float32),
                            pltpu.VMEM((C, 1), jnp.float32)],
        ),
        compiler_params=pltpu.CompilerParams(
            dimension_semantics=("parallel", "arbitrary"),
            vmem_limit_bytes=tiled_vmem,
        ),
    )(x_flat)

    # Hoisted tiny MLP + sigmoid (off the serial grid critical path).
    avg_p = pooled[:, :, 0] * (1.0 / HW)          # (B, C)
    max_p = pooled[:, :, 1]                       # (B, C)

    def mlp(p):
        return jnp.maximum(p @ w1f.T, 0.0) @ w2f.T

    scale = jax.nn.sigmoid(mlp(avg_p) + mlp(max_p))           # (B, C)
    scale3 = scale.reshape(B, 1, C).astype(jnp.float32)       # (B, 1, C)

    # Pass 2: channel-weighted sum per spatial tile (MXU matmul, lane-dense out).
    out_flat = pl.pallas_call(
        _ca_wsum_kernel,
        out_shape=jax.ShapeDtypeStruct((B, 1, HW), out_dtype),
        grid_spec=pltpu.PrefetchScalarGridSpec(
            num_scalar_prefetch=0,
            grid=(B, n_t),
            in_specs=[
                pl.BlockSpec((pl.Squeezed(), 1, C), lambda b, t: (b, 0, 0)),
                pl.BlockSpec((pl.Squeezed(), C, tile_hw),
                             lambda b, t: (b, 0, t)),
            ],
            out_specs=pl.BlockSpec((pl.Squeezed(), 1, tile_hw),
                                   lambda b, t: (b, 0, t)),
        ),
        compiler_params=pltpu.CompilerParams(
            dimension_semantics=("parallel", "parallel"),
            vmem_limit_bytes=tiled_vmem,
        ),
    )(scale3, x_flat)

    return out_flat.reshape(B, 1, H, W)


# ---------------------------------------------------------------------------
# Pure-JAX reference (mirrors the PyTorch forward).
# ---------------------------------------------------------------------------
def channel_attention_ref(x, w1, w2):
    avg_p = jnp.mean(x, axis=(2, 3), keepdims=True)   # (B, C, 1, 1)
    max_p = jnp.max(x, axis=(2, 3), keepdims=True)    # (B, C, 1, 1)

    def mlp(p):
        p = p[:, :, 0, 0]                              # (B, C)
        h = jnp.maximum(p @ w1.T, 0.0)                 # (B, C//r)
        return (h @ w2.T)[:, :, None, None]            # (B, C, 1, 1)

    out = mlp(avg_p) + mlp(max_p)
    scale = jax.nn.sigmoid(out)
    return jnp.sum(scale * x, axis=1, keepdims=True)   # (B, 1, H, W)


if __name__ == "__main__":
    key = jax.random.PRNGKey(0)
    kx, k1, k2, kx2 = jax.random.split(key, 4)

    B, C, H, W = 2, 4, 16, 16
    ratio = 2
    hidden = C // ratio

    x = jax.random.normal(kx, (B, C, H, W), dtype=jnp.float32)
    # 1x1 conv weights, no bias -> plain matrices.
    w1 = jax.random.normal(k1, (hidden, C), dtype=jnp.float32) * 0.5
    w2 = jax.random.normal(k2, (C, hidden), dtype=jnp.float32) * 0.5

    ref = channel_attention_ref(x, w1, w2)

    # 1) Resident double-buffered path (small slab -> one HBM read of x).
    out = jax.block_until_ready(channel_attention(x, w1, w2))
    assert out.shape == (B, 1, H, W)
    assert jnp.allclose(out, ref, atol=1e-5, rtol=1e-5), "resident path mismatch"

    # 2) Resident single-buffered path (manual DMA; used when only 1x fits).
    out_sb = jax.block_until_ready(
        channel_attention(x, w1, w2, force_single_buffer=True))
    assert jnp.allclose(out_sb, ref, atol=1e-5, rtol=1e-5), "single-buffer mismatch"

    # 3) Tiled two-pass fallback, HW divisible by the tile.
    out_t = jax.block_until_ready(
        channel_attention(x, w1, w2, force_tiled=True, tile_hw=128))
    assert jnp.allclose(out_t, ref, atol=1e-5, rtol=1e-5), "tiled path mismatch"

    # 4) Tiled fallback with a partial final tile (HW = 320, tile = 128) to
    #    exercise the last-tile-only overhang masking.
    H2, W2 = 16, 20
    x2 = jax.random.normal(kx2, (B, C, H2, W2), dtype=jnp.float32)
    ref2 = channel_attention_ref(x2, w1, w2)
    out2 = jax.block_until_ready(
        channel_attention(x2, w1, w2, force_tiled=True, tile_hw=128))
    assert out2.shape == (B, 1, H2, W2)
    assert jnp.allclose(out2, ref2, atol=1e-5, rtol=1e-5), "masked tile mismatch"

    # 5) bf16-streamed x (halves HBM bytes; f32 accumulation in-kernel).
    out_bf = jax.block_until_ready(
        channel_attention(x, w1, w2, stream_dtype=jnp.bfloat16))
    assert jnp.allclose(out_bf, ref, atol=1e-1, rtol=1e-1), "bf16 resident mismatch"
    out_bf_t = jax.block_until_ready(
        channel_attention(x, w1, w2, stream_dtype=jnp.bfloat16,
                          force_tiled=True, tile_hw=128))
    assert jnp.allclose(out_bf_t, ref, atol=1e-1, rtol=1e-1), "bf16 tiled mismatch"

    print("KERNEL_OK")
</pallas_src>

<mosaic_0001>
module attributes {stable_mosaic.version = 11 : i64} {
  func.func @_ca_resident_kernel(%arg0: i32, %arg1: memref<1x4x256xf32, #tpu.memory_space<vmem>>, %arg2: memref<2x4xf32, #tpu.memory_space<vmem>>, %arg3: memref<4x2xf32, #tpu.memory_space<vmem>>, %arg4: memref<1x1x256xf32, #tpu.memory_space<vmem>>) attributes {dimension_semantics = [#tpu.dimension_semantics<parallel>], iteration_bounds = array<i64: 2>, scalar_prefetch = 0 : i64, scratch_operands = 0 : i64, tpu.core_type = #tpu.core_type<tc>, window_params = [{transform_indices = @transform_0, window_bounds = array<i64: 1, 4, 256>}, {pipeline_mode = #tpu.pipeline_mode<synchronous>, transform_indices = @transform_1, window_bounds = array<i64: 2, 4>}, {pipeline_mode = #tpu.pipeline_mode<synchronous>, transform_indices = @transform_2, window_bounds = array<i64: 4, 2>}, {transform_indices = @transform_3, window_bounds = array<i64: 1, 1, 256>}]} {
    %c0 = arith.constant 0 : index
    %c0_0 = arith.constant 0 : index
    %c0_1 = arith.constant 0 : index
    %0 = vector.load %arg1[%c0, %c0_0, %c0_1] : memref<1x4x256xf32, #tpu.memory_space<vmem>>, vector<1x4x256xf32>
    %1 = vector.shape_cast %0 : vector<1x4x256xf32> to vector<4x256xf32>
    %c0_2 = arith.constant 0 : index
    %c0_3 = arith.constant 0 : index
    %2 = vector.load %arg2[%c0_2, %c0_3] : memref<2x4xf32, #tpu.memory_space<vmem>>, vector<2x4xf32>
    %c0_4 = arith.constant 0 : index
    %c0_5 = arith.constant 0 : index
    %3 = vector.load %arg3[%c0_4, %c0_5] : memref<4x2xf32, #tpu.memory_space<vmem>>, vector<4x2xf32>
    %cst = arith.constant dense<0.000000e+00> : vector<4xf32>
    %4 = vector.multi_reduction <add>, %1, %cst [1] : vector<4x256xf32> to vector<4xf32>
    %5 = vector.shape_cast %4 : vector<4xf32> to vector<4x1xf32>
    %cst_6 = arith.constant 3.906250e-03 : f32
    %6 = vector.broadcast %cst_6 : f32 to vector<4x1xf32>
    %7 = arith.mulf %5, %6 : vector<4x1xf32>
    %cst_7 = arith.constant dense<0xFF800000> : vector<4xf32>
    %8 = vector.multi_reduction <maximumf>, %1, %cst_7 [1] : vector<4x256xf32> to vector<4xf32>
    %9 = vector.shape_cast %8 : vector<4xf32> to vector<4x1xf32>
    %10 = tpu.concatenate %7, %9 in 1 : vector<4x1xf32>, vector<4x1xf32> -> vector<4x2xf32>
    %cst_8 = arith.constant dense<0.000000e+00> : vector<2x2xf32>
    %11 = tpu.matmul %2, %10, %cst_8 {dimension_numbers = #tpu.dot_dimension_numbers<[1], [0], [0], [1], [0, 0, 1, 1], [], []>} : vector<2x4xf32>, vector<4x2xf32>, vector<2x2xf32> -> vector<2x2xf32>
    %cst_9 = arith.constant 0.000000e+00 : f32
    %12 = vector.broadcast %cst_9 : f32 to vector<2x2xf32>
    %13 = arith.maximumf %11, %12 : vector<2x2xf32>
    %cst_10 = arith.constant dense<0.000000e+00> : vector<4x2xf32>
    %14 = tpu.matmul %3, %13, %cst_10 {dimension_numbers = #tpu.dot_dimension_numbers<[1], [0], [0], [1], [0, 0, 1, 1], [], []>} : vector<4x2xf32>, vector<2x2xf32>, vector<4x2xf32> -> vector<4x2xf32>
    %15 = vector.extract_strided_slice %14 {offsets = [0, 0], sizes = [4, 1], strides = [1, 1]} : vector<4x2xf32> to vector<4x1xf32>
    %16 = vector.extract_strided_slice %14 {offsets = [0, 1], sizes = [4, 1], strides = [1, 1]} : vector<4x2xf32> to vector<4x1xf32>
    %17 = arith.addf %15, %16 : vector<4x1xf32>
    %18 = arith.negf %17 : vector<4x1xf32>
    %19 = math.exp %18 : vector<4x1xf32>
    %cst_11 = arith.constant 1.000000e+00 : f32
    %20 = vector.broadcast %cst_11 : f32 to vector<4x1xf32>
    %21 = arith.addf %20, %19 : vector<4x1xf32>
    %22 = arith.divf %20, %21 : vector<4x1xf32>
    %cst_12 = arith.constant dense<0.000000e+00> : vector<1x256xf32>
    %23 = tpu.matmul %22, %1, %cst_12 {dimension_numbers = #tpu.dot_dimension_numbers<[0], [0], [1], [1], [0, 1, 1, 1], [], []>} : vector<4x1xf32>, vector<4x256xf32>, vector<1x256xf32> -> vector<1x256xf32>
    %c0_13 = arith.constant 0 : index
    %c0_14 = arith.constant 0 : index
    %c0_15 = arith.constant 0 : index
    %24 = vector.load %arg4[%c0_13, %c0_14, %c0_15] : memref<1x1x256xf32, #tpu.memory_space<vmem>>, vector<1x1x256xf32>
    %25 = vector.shape_cast %24 : vector<1x1x256xf32> to vector<1x256xf32>
    %26 = vector.shape_cast %23 : vector<1x256xf32> to vector<1x1x256xf32>
    tpu.vector_store %arg4[%c0_13, %c0_14, %c0_15], %26 {strides = array<i32>} : memref<1x1x256xf32, #tpu.memory_space<vmem>>, vector<1x1x256xf32>,
    return
  }
  func.func @transform_0(%arg0: i32) -> (i32, i32, i32) {
    %c0_i32 = arith.constant 0 : i32
    %c0_i32_0 = arith.constant 0 : i32
    %c0_i32_1 = arith.constant 0 : i32
    return %arg0, %c0_i32, %c0_i32_0 : i32, i32, i32
  }
  func.func @transform_1(%arg0: i32) -> (i32, i32) {
    %c0_i32 = arith.constant 0 : i32
    %c0_i32_0 = arith.constant 0 : i32
    %c0_i32_1 = arith.constant 0 : i32
    return %c0_i32, %c0_i32_0 : i32, i32
  }
  func.func @transform_2(%arg0: i32) -> (i32, i32) {
    %c0_i32 = arith.constant 0 : i32
    %c0_i32_0 = arith.constant 0 : i32
    %c0_i32_1 = arith.constant 0 : i32
    return %c0_i32, %c0_i32_0 : i32, i32
  }
  func.func @transform_3(%arg0: i32) -> (i32, i32, i32) {
    %c0_i32 = arith.constant 0 : i32
    %c0_i32_0 = arith.constant 0 : i32
    %c0_i32_1 = arith.constant 0 : i32
    return %arg0, %c0_i32, %c0_i32_0 : i32, i32, i32
  }
}

</mosaic_0001>

<bundles_post_ra>
// kernel: tpu_custom_call.1
= control target key start
LH: loop header
LB: loop body
LE: loop exit
PB: predicated region body
PF: predicated region fallthrough
CT: control target
= control target key end

     0   :  { %8 = vsyncpa [#allocation3], 0  ;;  %s986_s0 = inlined_call_operand.hbm [shape: f32[2,4,256], index: 0, kind: input, shape index: {}]   ;;  %s987_s1 = inlined_call_operand.vmem [shape: f32[2,4], index: 1, kind: input, shape index: {}]   ;;  %s988_s2 = inlined_call_operand.vmem [shape: f32[4,2], index: 2, kind: input, shape index: {}]   ;;  %s989_s3 = inlined_call_operand.hbm [shape: f32[2,1,256], index: 3, kind: output, shape index: {}]  }
   0x1   :  { %10 = vsyncpa [#allocation3 + $0x1], 0 }
   0x2   :  { %11 = vsyncpa [#allocation4], 0 }
   0x3   :  { %13 = vsyncpa [#allocation4 + $0x1], 0  ;;  %s809_s12 = smov 0   ;;  %s811_s13 = smov 0  }
   0x4   :  { %s813_s14 = smov 0   ;;  %s815_s15 = smov 0  }
   0x5 LB: > { %s830_s16 = sadd.s32 4294967295, %s781_s15   ;;  %s592_s17 = sadd.s32 4294967294, %s781_s15   ;;  %s781_s15 = sphi %s815_s15, %s1004_s15   ;;  %s777_s14 = sphi %s813_s14, %s1003_s14   ;;  %s773_s13 = sphi %s811_s13, %s1002_s13   ;;  %s769_s12 = sphi %s809_s12, %s1001_s12  }
   0x6   : > { %s834_s18 = sadd.s32 1, %s781_s15   ;;  %s26_s19 = sadd.s32 1, %s777_s14 }
   0x7   : > { %s23_s20 = ssub.s32 %s781_s15, %s834_s18  ;;  %p33_p0 = scmp.ne.s32.totalorder %s777_s14, %s773_s13 }
   0x8   : > { %p24_p1 = scmp.eq.s32.totalorder %s23_s20, 0  ;;  %p34_p2 = scmp.eq.s32.totalorder %s781_s15, 0 }
   0x9   : > { %p39_p3 = scmp.ne.s32.totalorder %s773_s13, %s769_s12  ;;  %p40_p4 = scmp.eq.s32.totalorder %s830_s16, 0 }
   0xa   : > { %s846_s21 = scalar_select %p24_p1, %s777_s14, %s26_s19  }
   0xb   : > { %p848_p5 = por %p34_p2, %p33_p0  ;;  %p852_p6 = por %p40_p4, %p39_p3 }
   0xc   : > { %p105_p7 = scmp.eq.s32.totalorder %s830_s16, 1  ;;  %p111_p8 = scmp.eq.s32.totalorder %s592_s17, 1 }
   0xd   : > { %p642_p10 = scmp.lt.s32.totalorder %s781_s15, 2  ;;  %s137_s26 = sand.u32 1, %s777_s14  }
   0xe   : > { %p859_p11 = por %p105_p7, %p33_p0  ;;  %p863_p12 = por %p111_p8, %p39_p3 }
   0xf   : > { %s614_s27 = sshll.u32 %s781_s15, 7  ;;  %s595_s28 = sshll.u32 %s137_s26, 3 }
  0x10   : > { %s993_s24 = scalar_select %p859_p11, 1, 0 }
  0x11   : > { %s994_s25 = scalar_select %p863_p12, 1, 0 }
  0x12   : > { %s872_s4 = scalar_lea.hbm %s986_s0, %s614_s27  ;;  %s141_s5 = scalar_lea.vmem [#allocation2], %s595_s28 }
  0x13   : > { %s149_s6 = sshll.u32 %s141_s5, 4  ;;  %p876_p13 = pnand %p642_p10, %p848_p5  ;;  %s880_s6 = int_to_ptr.vmem [resolvable:$true] %s149_s6 }
  0x14   : > { %s138_s8 = scalar_lea.sflag [#allocation3], %s137_s26  ;;  %s685_s9 = scalar_lea.hbm %s872_s4, 128 }
  0x15   : > { %p686_p2 = scmp.ne.s32.totalorder %s872_s4, %s685_s9  ;;  %p687_p3 = pneg %p876_p13 }
  0x16   : > { %s690_s17 = scalar_lea.hbm %s986_s0, 256  ;;  %p691_p5 = scmp.lt.u32.totalorder %s872_s4, %s986_s0 }
  0x17   : > { %p688_p4 = pnand %p687_p3, %p686_p2  ;;  %p692_p8 = scmp.lt.u32.totalorder %s690_s17, %s685_s9 }
  0x18   : > { %p694_p9 = scmp.lt.u32.totalorder %s685_s9, %s872_s4 }
  0x19   : > { %p689_p7 = pneg %p688_p4  ;;  %p693_p10 = por %p692_p8, %p691_p5 }
  0x1b   : > { %p695_p0 = por %p694_p9, %p693_p10 }
  0x1d   : > { %p696_p1 = pnand %p695_p0, %p689_p7 }
  0x1f   : > { %699 = shalt.err (!%p696_p1)
}
  0x20   : > { %s700_s22 = scalar_lea.vmem %s880_s6, 128  ;;  %s783_s26 = smov [#allocation2]  }
  0x21   : > { %p701_p2 = scmp.ne.s32.totalorder %s880_s6, %s700_s22  ;;  %s705_s27 = sshll.u32 %s783_s26, 4  ;;  %s706_s27 = int_to_ptr.vmem [resolvable:$false] %s705_s27 }
  0x22   : > { %s707_s28 = scalar_lea.vmem %s706_s27, 256  ;;  %p708_p11 = scmp.lt.s32.totalorder %s880_s6, %s706_s27 }
  0x23   : > { %p703_p4 = pnand %p701_p2, %p687_p3  ;;  %p709_p5 = scmp.lt.s32.totalorder %s707_s28, %s700_s22 }
  0x25   : > { %p704_p12 = pneg %p703_p4  ;;  %p710_p8 = por %p709_p5, %p708_p11 }
  0x27   : > { %p711_p9 = pnand %p710_p8, %p704_p12 }
  0x29   : > { %714 = shalt.err (!%p711_p9)
}
  0x2a   : > { %637 = dma.hbm_to_vmem [thread:$0]  (!%p876_p13), %s872_s4, 128, %s880_s6, %s138_s8  }
  0x2b   : > { %p996_p0 = scmp.lt.s32.totalorder %s781_s15, 3  ;;  %p997_p1 = scmp.ge.s32.totalorder %s781_s15, 1 }
  0x2d   : > { %p155_p3 = pnand %p997_p1, %p996_p0 }
  0x2e   : > { %s914_s29 = sand.u32 (!%p155_p3), 1, %s773_s13  }
  0x2f   : > { %158 = sbr.rel (%p155_p3) target bundleno = 1141 (0x475), region = 32  ;;  %s599_s30 = sshll.u32 (!%p155_p3), %s914_s29, 3 }
  0x30   : > { %s161_s5 = scalar_lea.sflag (!%p155_p3), [#allocation3], %s914_s29  ;;  %s164_s9 = scalar_lea.vmem (!%p155_p3), [#allocation2], %s599_s30 }
  0x36   : > { %760 = dma.done.wait (%p852_p6), %s161_s5, 128  }
  0x37   : > { %762 = vsyncadd (%p852_p6), %s161_s5, 4294967168  ;;  %vm193_vm0 = vcmask 1043456   ;;  %v187_v0 = vld [vmem:[%s164_s9] sm:$0xff]  ;;  %v784_v8 = vmov 0.0   ;;  %vm785_vm1 = vmmov 0   ;;  %vm205_vm2 = vcmask 7168  }
  0x38   : > { %v191_v1 = vcombine.high %v187_v0, %v187_v0  ;;  %v194_v2 = vsel %vm193_vm0, %v187_v0, 0.0  ;;  %v200_v4 = vsel %vm193_vm0, %v187_v0, -inf  ;;  %620 = vmatprep.subr.mxu0 %v784_v8  ;;  %625 = vmatprep.subr.mxu1 %v784_v8  ;;  %v188_v12 = vld [vmem:[%s987_s1] sm:$0x3]  ;;  %vm207_vm3 = vcmask 31744   ;;  %s786_s8 = smov 127  }
  0x39   : > { %622 = vmatprep.mubr.msk.f32.mxu0 %vm785_vm1, %v784_v8  ;;  %627 = vmatprep.mubr.msk.f32.mxu1 %vm785_vm1, %v784_v8  ;;  %vm289_vm4 = vcmask 1041408   ;;  %v189_v17 = vld [vmem:[%s988_s2] sm:$0xf]  ;;  %vm285_vm5 = vcmask 15360   ;;  %v787_v27 = vmov 1966171168   ;;  %v490_v29 = vlaneseq }
  0x3a   : > { %v195_v3 = vsel %vm193_vm0, %v191_v1, 0.0  ;;  %v201_v5 = vsel %vm193_vm0, %v191_v1, -inf  ;;  %v488_v28 = vunpack.c.l.s4 %v787_v27  ;;  %s600_s10 = sshll.u32 %s914_s29, 1  ;;  %s615_s11 = sshll.u32 %s830_s16, 5 }
  0x3b   : > { %v196_v6 = vadd.f32 %v195_v3, %v194_v2  ;;  %v202_v7 = vmax.f32 %v200_v4, %v201_v5  ;;  %v491_v31 = vshrl.u32 %v490_v29, 7  ;;  %s186_s17 = scalar_lea.vmem [#allocation5], %s600_s10  ;;  %vm504_vm6 = vcmp.lt.s32.totalorder %v490_v29, 256  ;;  %s942_s26 = scalar_lea.hbm %s989_s3, %s615_s11 }
  0x3c   : > { %v489_v30 = vunpack.c.0.s8 %v488_v28  ;;  %s522_s19 = sshll.u32 %s186_s17, 4  ;;  %s508_s27 = scalar_lea.sflag [#allocation4], %s914_s29  ;;  %s944_s19 = int_to_ptr.vmem [resolvable:$true] %s522_s19 }
  0x3d   : > { %197 = vadd.xlane.f32.xlu0 %v196_v6  ;;  %s715_s28 = scalar_lea.vmem %s944_s19, 32  ;;  %p998_p11 = scmp.ne.s32.totalorder %s993_s24, 0 }
  0x3e   : > { %v492_v33 = vsub.s32 %v489_v30, %v491_v31  ;;  %p716_p6 = scmp.ne.s32.totalorder %s944_s19, %s715_s28  ;;  %s788_s16 = smov [#allocation5]  }
  0x3f   : > { %s719_s30 = sshll.u32 %s788_s16, 4  ;;  %s720_s30 = int_to_ptr.vmem [resolvable:$false] %s719_s30 }
  0x40   : > { %p717_p12 = pnand %p716_p6, %p998_p11  ;;  %s721_s5 = scalar_lea.vmem %s720_s30, 64 }
  0x41   : > { %203 = vmax.xlane.f32.xlu0 %v202_v7  ;;  %p722_p7 = scmp.lt.s32.totalorder %s944_s19, %s720_s30  ;;  %p723_p10 = scmp.lt.s32.totalorder %s721_s5, %s715_s28 }
  0x42   : > { %p718_p13 = pneg %p717_p12 }
  0x43   : > { %p724_p2 = por %p723_p10, %p722_p7 }
  0x45   : > { %p725_p4 = pnand %p724_p2, %p718_p13 }
  0xca   : > { %v198_v9 = vpop.xlane.xlu0 %197 }
  0xcb   : > { %v199_v10 = vmul.f32 0.00390625, %v198_v9 }
  0xce   : > { %v204_v11 = vpop.xlane.xlu0 %203 }
  0xcf   : > { %v206_v13 = vsel %vm205_vm2, %v199_v10, %v204_v11 }
  0xd0   : > { %621 = vmatpush3.msk.msra.mxu0 %vm193_vm0, %v206_v13 }
  0xd1   : > { %623 = vmatmul.mubr.msk.f32.vlgmr.msra.gmra.mrb[0].mxu0 %vm207_vm3, %v188_v12  ;;  %606 = vmatprep.subr.msk.mxu0 %vm193_vm0, %v191_v1 }
  0xd2   : > { %607 = vmatpush1.msk.msra.mxu0 %vm193_vm0, %v187_v0  ;;  %477 = vmatprep.mubr.f32.mxu0 %v784_v8 }
 0x1a4   : > { %v280_v14 = vpop.f32.mrb[0].mxu0 }
 0x1a5   : > { %v284_v15 = vmax.f32 %v280_v14, 0.0  ;;  %v624_v16 = vpop.f32.mrb[1].mxu0 }
 0x1a7   : > { %626 = vmatpush3.msk.msra.mxu1 %vm289_vm4, %v284_v15 }
 0x1a8   : > { %628 = vmatmul.mubr.msk.f32.vlgmr.msra.gmra.mrb[0].mxu1 %vm285_vm5, %v189_v17 }
 0x27b   : > { %v359_v18 = vpop.f32.mrb[0].mxu1 }
 0x27c   : > { %364 = vrot.lane.b32.xlu1 %v359_v18, %s786_s8  ;;  %v629_v19 = vpop.f32.mrb[1].mxu1 }
 0x2ee   : > { %v365_v20 = vpop.permute.xlu1 %364 }
 0x2ef   : > { %v367_v21 = vadd.f32 %v365_v20, %v359_v18 }
 0x2f1   : > { %v605_v22 = vmul.f32 -1.442695, %v367_v21 }
 0x2f3   : > { %681 = vpow2.f32 %v605_v22 }
 0x2fd   : > { %v682_v23 = vpop.eup %681 }
 0x2fe   : > { %v371_v24 = vadd.f32 1.0, %v682_v23 }
 0x300   : > { %683 = vrcp.f32 %v371_v24 }
 0x30a   : > { %v684_v25 = vpop.eup %683 }
 0x30b   : > { %374 = vxpose.xlu1.b32.start.end [1/1] (short) (narrow) %v684_v25, 8 }
 0x38b   : > { %v390_v26 = vpop.trf.xlu1 }
 0x38c   : > { %608 = vmatmul.mubr.msk.f32.vlgmr.msra.gmra.mrb[2].mxu0 %vm207_vm3, %v390_v26 }
 0x45f   : > { %v479_v32 = vpop.f32.mrb[2].mxu0 }
 0x460   : > { %v481_v34 = vpop.f32.mrb[3].mxu0 }
 0x461   : > { %v486_v35 = vcombine.low %v479_v32, %v481_v34 }
 0x463   : > { %v493_v36 = vrot.slane %v486_v35, %v492_v33 }
 0x465   : > { %v500_v37 = vrot.slane %v493_v36, %v492_v33 }
 0x467   : > { %506 = vst.msk [vmem:[%s186_s17] sm:$0x3] %vm504_vm6, %v500_v37 }
 0x468   : > { %728 = shalt.err (!%p725_p4)
}
 0x469   : > { %s729_s29 = scalar_lea.hbm %s942_s26, 32  ;;  %s733_s4 = scalar_lea.hbm %s989_s3, 64 }
 0x46a   : > { %p730_p5 = scmp.ne.s32.totalorder %s942_s26, %s729_s29  ;;  %p734_p0 = scmp.lt.u32.totalorder %s942_s26, %s989_s3 }
 0x46b   : > { %p735_p1 = scmp.lt.u32.totalorder %s733_s4, %s729_s29  ;;  %p737_p6 = scmp.lt.u32.totalorder %s729_s29, %s942_s26 }
 0x46c   : > { %p731_p8 = pnand %p730_p5, %p998_p11 }
 0x46d   : > { %p736_p3 = por %p735_p1, %p734_p0 }
 0x46e   : > { %p732_p9 = pneg %p731_p8 }
 0x46f   : > { %p738_p12 = por %p737_p6, %p736_p3 }
 0x471   : > { %p739_p13 = pnand %p738_p12, %p732_p9 }
 0x473   : > { %742 = shalt.err (!%p739_p13)
}
 0x474   : > { %632 = dma.vmem_to_hbm [thread:$0]  (%p998_p11), %s944_s19, 32, %s942_s26, %s508_s27  }
 0x475 PF: > { %s534_s8 = sand.u32 1, %s769_s12   ;;  %p999_p7 = scmp.ne.s32.totalorder %s994_s25, 0 }
 0x476   : > { %p1000_p10 = scmp.ge.s32.totalorder %s781_s15, 2  ;;  %s535_s10 = scalar_lea.sflag [#allocation4], %s534_s8 }
 0x478   : > { %p639_p2 = pnand %p1000_p10, %p999_p7 }
 0x47a   : > { %764 = dma.done.wait (!%p639_p2), %s535_s10, 32  }
 0x47b   : > { %766 = vsyncadd (!%p639_p2), %s535_s10, 4294967264  ;;  %p16_p4 = scmp.ge.s32.totalorder %s834_s18, 4   ;;  %s1001_s12 = smov %s773_s13 }
 0x47c   : > { %s1002_s13 = smov %s777_s14  ;;  %s1003_s14 = smov %s846_s21 }
 0x47d   : > { %s1004_s15 = smov %s834_s18  ;;  %18 = sbr.rel (!%p16_p4) target bundleno = 5 (0x5), region = 77 }
 0x484   :  { %540 = vsyncpa [#allocation3], 1 }
 0x485   :  { %542 = vsyncpa [#allocation3 + $0x1], 1 }
 0x486   :  { %543 = vsyncpa [#allocation4], 1 }
 0x487   :  { %545 = vsyncpa [#allocation4 + $0x1], 1 }

</bundles_post_ra>
